<compile_context>
chip_gen: v7x
topology: tpu7x:2x2x1
jax: 0.10.0
libtpu: 0.0.40
codegen_flags: <defaults>
</compile_context>

<pallas_src>
import math

import jax
import jax.numpy as jnp
from jax.experimental import pallas as pl
from jax.experimental.pallas import tpu as pltpu

# ---------------------------------------------------------------------------
# Model hyper-parameters.
# ---------------------------------------------------------------------------
E = 128          # model_dimension (lane-aligned stand-in for 192)
H = 4            # heads
DH = E // H      # head dim
P = 256          # projection_dimension
L = 8            # sequence length
N = 2            # batch
NL = N * L       # folded M-dimension (row i  <->  (l = i // N, n = i % N))
E3 = 3 * E       # fused QKV width
EPS = 1e-5       # LayerNorm eps (PyTorch default)
NEG_INF = -1e30  # mask value for cross-batch attention entries

# Row layout of the packed bias/LayerNorm-parameter array (f32, (8, 3E)):
#   0: [bq*scale | bk | bv]   (1, 384)
#   1: [b1 | zero pad]        (b1 occupies lanes 0:256)
#   2: [bo      | pad]  3: [ln1_w | pad]  4: [ln1_b | pad]
#   5: [b2      | pad]  6: [ln2_w | pad]  7: [ln2_b | pad]


def transformer_block_kernel(
    x_ref,      # (NL, E)  f32   activations, rows = (l, n) row-major fold
    wqkv_ref,   # (E, 3E)  bf16  [Wq*scale | Wk | Wv], laid out so y = x @ W
    wo_ref,     # (E, E)   bf16
    w1_ref,     # (E, P)   bf16
    w2_ref,     # (P, E)   bf16
    bias_ref,   # (8, 3E)  f32   packed biases / LN params (see layout above)
    out_ref,    # (NL, E)  f32
):
    x = x_ref[...]                              # (16, 128) f32, dense tile
    xb = x.astype(jnp.bfloat16)

    bias = bias_ref[...]
    bqkv  = bias[0:1, :]                        # (1, 384)
    b1    = bias[1:2, 0:P]                      # (1, 256)
    bo    = bias[2:3, 0:E]
    ln1_w = bias[3:4, 0:E]
    ln1_b = bias[4:5, 0:E]
    b2    = bias[5:6, 0:E]
    ln2_w = bias[6:7, 0:E]
    ln2_b = bias[7:8, 0:E]

    # ---- Fused QKV projection: one bf16 MXU dot, one bias add ---------------
    qkv = jnp.dot(xb, wqkv_ref[...],
                  preferred_element_type=jnp.float32) + bqkv        # (16, 384)
    # q already carries the 1/sqrt(DH) scale (folded into Wq/bq in wrapper).
    qb = qkv[:, 0:E].astype(jnp.bfloat16)
    kb = qkv[:, E:2 * E].astype(jnp.bfloat16)
    vb = qkv[:, 2 * E:3 * E].astype(jnp.bfloat16)

    # Block-diagonal mask: tokens only attend within their own batch element.
    row_b = jax.lax.broadcasted_iota(jnp.int32, (NL, NL), 0) % N
    col_b = jax.lax.broadcasted_iota(jnp.int32, (NL, NL), 1) % N
    same_batch = row_b == col_b

    # ---- Per-head attention (static unroll), bf16 operands, f32 math --------
    contract_last = (((1,), (1,)), ((), ()))    # q·kᵀ without materializing kᵀ
    head_outs = []
    for h in range(H):
        sl = slice(h * DH, (h + 1) * DH)
        qh, kh, vh = qb[:, sl], kb[:, sl], vb[:, sl]          # (16, 32) bf16
        s = jax.lax.dot_general(qh, kh, contract_last,
                                preferred_element_type=jnp.float32)  # (16, 16)
        s = jnp.where(same_batch, s, NEG_INF)
        s = s - jnp.max(s, axis=-1, keepdims=True)
        p = jnp.exp(s)
        p = p * pl.reciprocal(jnp.sum(p, axis=-1, keepdims=True), approx=True)
        ho = jnp.dot(p.astype(jnp.bfloat16), vh,
                     preferred_element_type=jnp.float32)      # (16, 32) f32
        head_outs.append(ho.astype(jnp.bfloat16))

    # Assemble heads into one (16, 128) bf16 tile -> SINGLE Wo dot (K = 128).
    attn_heads = jnp.concatenate(head_outs, axis=-1)          # (16, 128) bf16
    attn = jnp.dot(attn_heads, wo_ref[...],
                   preferred_element_type=jnp.float32) + bo

    # ---- Residual + LayerNorm 1 (dropout1 = identity), f32 math -------------
    y = x + attn
    mu = jnp.mean(y, axis=-1, keepdims=True)
    var = jnp.mean((y - mu) ** 2, axis=-1, keepdims=True)
    y = (y - mu) * jax.lax.rsqrt(var + EPS) * ln1_w + ln1_b

    # ---- Feed-forward: Linear -> ReLU -> (Dropout=id) -> Linear --------------
    h1 = jnp.dot(y.astype(jnp.bfloat16), w1_ref[...],
                 preferred_element_type=jnp.float32) + b1
    h1 = jnp.maximum(h1, 0.0)
    ff = jnp.dot(h1.astype(jnp.bfloat16), w2_ref[...],
                 preferred_element_type=jnp.float32) + b2

    # ---- Residual + LayerNorm 2 (dropout2 = identity), f32 math --------------
    z = y + ff
    mu2 = jnp.mean(z, axis=-1, keepdims=True)
    var2 = jnp.mean((z - mu2) ** 2, axis=-1, keepdims=True)
    z = (z - mu2) * jax.lax.rsqrt(var2 + EPS) * ln2_w + ln2_b

    out_ref[...] = z.astype(out_ref.dtype)


def _full_spec(shape):
    nd = len(shape)
    return pl.BlockSpec(shape, lambda i, _nd=nd: (0,) * _nd)


@jax.jit
def transformer_block(x_lne, params):
    """x_lne: (L, N, E) like PyTorch's seq-first MultiheadAttention input."""
    (wq, wk, wv, bq, bk, bv, wo, bo,
     ln1_w, ln1_b, w1, b1, w2, b2, ln2_w, ln2_b) = params

    scale = 1.0 / math.sqrt(DH)

    # Pack / cast parameters (wrapper-side XLA, once per call).
    wqkv = jnp.concatenate([wq * scale, wk, wv], axis=1).astype(jnp.bfloat16)
    wob = wo.astype(jnp.bfloat16)
    w1b = w1.astype(jnp.bfloat16)
    w2b = w2.astype(jnp.bfloat16)

    def _pad_to_3e(v):
        return jnp.concatenate(
            [v, jnp.zeros((1, E3 - v.shape[1]), jnp.float32)], axis=1)

    bias_pack = jnp.concatenate(
        [jnp.concatenate([bq * scale, bk, bv], axis=1),   # row 0: fused qkv bias
         _pad_to_3e(b1),                                  # row 1
         _pad_to_3e(bo), _pad_to_3e(ln1_w), _pad_to_3e(ln1_b),
         _pad_to_3e(b2), _pad_to_3e(ln2_w), _pad_to_3e(ln2_b)],
        axis=0)                                           # (8, 384) f32

    # Metadata-only row-major fold: (L, N, E) -> (N*L, E); kernel sees a dense
    # (16, 128) tile. Row i = (l = i // N, n = i % N), matching the %N mask.
    x2d = x_lne.reshape(NL, E)

    out2d = pl.pallas_call(
        transformer_block_kernel,
        out_shape=jax.ShapeDtypeStruct((NL, E), jnp.float32),
        grid_spec=pltpu.PrefetchScalarGridSpec(
            num_scalar_prefetch=0,
            grid=(1,),
            in_specs=[
                _full_spec((NL, E)),    # x (f32)
                _full_spec((E, E3)),    # fused Wq|Wk|Wv (bf16)
                _full_spec((E, E)),     # Wo (bf16)
                _full_spec((E, P)),     # W1 (bf16)
                _full_spec((P, E)),     # W2 (bf16)
                _full_spec((8, E3)),    # packed biases / LN params (f32)
            ],
            out_specs=_full_spec((NL, E)),
        ),
        compiler_params=pltpu.CompilerParams(
            dimension_semantics=("arbitrary",),
        ),
    )(x2d, wqkv, wob, w1b, w2b, bias_pack)

    return out2d.reshape(L, N, E)


def init_params(key):
    ks = jax.random.split(key, 12)
    s = 0.02
    wq = jax.random.normal(ks[0], (E, E), jnp.float32) * s
    wk = jax.random.normal(ks[1], (E, E), jnp.float32) * s
    wv = jax.random.normal(ks[2], (E, E), jnp.float32) * s
    bq = jax.random.normal(ks[3], (1, E), jnp.float32) * s
    bk = jax.random.normal(ks[4], (1, E), jnp.float32) * s
    bv = jax.random.normal(ks[5], (1, E), jnp.float32) * s
    wo = jax.random.normal(ks[6], (E, E), jnp.float32) * s
    bo = jax.random.normal(ks[7], (1, E), jnp.float32) * s
    ln1_w = jnp.ones((1, E), jnp.float32)
    ln1_b = jnp.zeros((1, E), jnp.float32)
    w1 = jax.random.normal(ks[8], (E, P), jnp.float32) * s
    b1 = jax.random.normal(ks[9], (1, P), jnp.float32) * s
    w2 = jax.random.normal(ks[10], (P, E), jnp.float32) * s
    b2 = jax.random.normal(ks[11], (1, E), jnp.float32) * s
    ln2_w = jnp.ones((1, E), jnp.float32)
    ln2_b = jnp.zeros((1, E), jnp.float32)
    return (wq, wk, wv, bq, bk, bv, wo, bo,
            ln1_w, ln1_b, w1, b1, w2, b2, ln2_w, ln2_b)


if __name__ == "__main__":
    key = jax.random.PRNGKey(0)
    kx, kp = jax.random.split(key)
    x = jax.random.normal(kx, (L, N, E), jnp.float32)  # (seq, batch, embed)
    params = init_params(kp)

    out = transformer_block(x, params)
    jax.block_until_ready(out)
    assert out.shape == (L, N, E)
    print("KERNEL_OK")
</pallas_src>

<mosaic_0001>
module attributes {stable_mosaic.version = 11 : i64} {
  func.func @transformer_block_kernel(%arg0: i32, %arg1: memref<16x128xf32, #tpu.memory_space<vmem>>, %arg2: memref<128x384xbf16, #tpu.memory_space<vmem>>, %arg3: memref<128x128xbf16, #tpu.memory_space<vmem>>, %arg4: memref<128x256xbf16, #tpu.memory_space<vmem>>, %arg5: memref<256x128xbf16, #tpu.memory_space<vmem>>, %arg6: memref<8x384xf32, #tpu.memory_space<vmem>>, %arg7: memref<16x128xf32, #tpu.memory_space<vmem>>) attributes {dimension_semantics = [#tpu.dimension_semantics<arbitrary>], iteration_bounds = array<i64: 1>, scalar_prefetch = 0 : i64, scratch_operands = 0 : i64, tpu.core_type = #tpu.core_type<tc>, window_params = [{pipeline_mode = #tpu.pipeline_mode<synchronous>, transform_indices = @transform_0, window_bounds = array<i64: 16, 128>}, {pipeline_mode = #tpu.pipeline_mode<synchronous>, transform_indices = @transform_1, window_bounds = array<i64: 128, 384>}, {pipeline_mode = #tpu.pipeline_mode<synchronous>, transform_indices = @transform_2, window_bounds = array<i64: 128, 128>}, {pipeline_mode = #tpu.pipeline_mode<synchronous>, transform_indices = @transform_3, window_bounds = array<i64: 128, 256>}, {pipeline_mode = #tpu.pipeline_mode<synchronous>, transform_indices = @transform_4, window_bounds = array<i64: 256, 128>}, {pipeline_mode = #tpu.pipeline_mode<synchronous>, transform_indices = @transform_5, window_bounds = array<i64: 8, 384>}, {pipeline_mode = #tpu.pipeline_mode<synchronous>, transform_indices = @transform_6, window_bounds = array<i64: 16, 128>}]} {
    %c0 = arith.constant 0 : index
    %c0_0 = arith.constant 0 : index
    %0 = vector.load %arg1[%c0, %c0_0] : memref<16x128xf32, #tpu.memory_space<vmem>>, vector<16x128xf32>
    %1 = arith.truncf %0 : vector<16x128xf32> to vector<16x128xbf16>
    %c0_1 = arith.constant 0 : index
    %c0_2 = arith.constant 0 : index
    %2 = vector.load %arg6[%c0_1, %c0_2] : memref<8x384xf32, #tpu.memory_space<vmem>>, vector<8x384xf32>
    %3 = vector.extract_strided_slice %2 {offsets = [0, 0], sizes = [1, 384], strides = [1, 1]} : vector<8x384xf32> to vector<1x384xf32>
    %4 = vector.extract_strided_slice %2 {offsets = [1, 0], sizes = [1, 256], strides = [1, 1]} : vector<8x384xf32> to vector<1x256xf32>
    %5 = vector.extract_strided_slice %2 {offsets = [2, 0], sizes = [1, 128], strides = [1, 1]} : vector<8x384xf32> to vector<1x128xf32>
    %6 = vector.extract_strided_slice %2 {offsets = [3, 0], sizes = [1, 128], strides = [1, 1]} : vector<8x384xf32> to vector<1x128xf32>
    %7 = vector.extract_strided_slice %2 {offsets = [4, 0], sizes = [1, 128], strides = [1, 1]} : vector<8x384xf32> to vector<1x128xf32>
    %8 = vector.extract_strided_slice %2 {offsets = [5, 0], sizes = [1, 128], strides = [1, 1]} : vector<8x384xf32> to vector<1x128xf32>
    %9 = vector.extract_strided_slice %2 {offsets = [6, 0], sizes = [1, 128], strides = [1, 1]} : vector<8x384xf32> to vector<1x128xf32>
    %10 = vector.extract_strided_slice %2 {offsets = [7, 0], sizes = [1, 128], strides = [1, 1]} : vector<8x384xf32> to vector<1x128xf32>
    %c0_3 = arith.constant 0 : index
    %c0_4 = arith.constant 0 : index
    %11 = vector.load %arg2[%c0_3, %c0_4] : memref<128x384xbf16, #tpu.memory_space<vmem>>, vector<128x384xbf16>
    %cst = arith.constant dense<0.000000e+00> : vector<16x384xf32>
    %12 = tpu.matmul %1, %11, %cst {dimension_numbers = #tpu.dot_dimension_numbers<[1], [0], [0], [1], [0, 0, 1, 1], [], []>} : vector<16x128xbf16>, vector<128x384xbf16>, vector<16x384xf32> -> vector<16x384xf32>
    %13 = vector.broadcast %3 : vector<1x384xf32> to vector<16x384xf32>
    %14 = arith.addf %12, %13 : vector<16x384xf32>
    %15 = vector.extract_strided_slice %14 {offsets = [0, 0], sizes = [16, 128], strides = [1, 1]} : vector<16x384xf32> to vector<16x128xf32>
    %16 = arith.truncf %15 : vector<16x128xf32> to vector<16x128xbf16>
    %17 = vector.extract_strided_slice %14 {offsets = [0, 128], sizes = [16, 128], strides = [1, 1]} : vector<16x384xf32> to vector<16x128xf32>
    %18 = arith.truncf %17 : vector<16x128xf32> to vector<16x128xbf16>
    %19 = vector.extract_strided_slice %14 {offsets = [0, 256], sizes = [16, 128], strides = [1, 1]} : vector<16x384xf32> to vector<16x128xf32>
    %20 = arith.truncf %19 : vector<16x128xf32> to vector<16x128xbf16>
    %21 = tpu.iota {dimensions = array<i32: 0>} : vector<16x16xi32>
    %c2_i32 = arith.constant 2 : i32
    %c0_i32 = arith.constant 0 : i32
    %22 = arith.cmpi eq, %c2_i32, %c0_i32 : i32
    %c1_i32 = arith.constant 1 : i32
    %23 = arith.select %22, %c1_i32, %c2_i32 : i32
    %24 = vector.broadcast %23 : i32 to vector<16x16xi32>
    %25 = arith.remsi %21, %24 : vector<16x16xi32>
    %c0_i32_5 = arith.constant 0 : i32
    %26 = vector.broadcast %c0_i32_5 : i32 to vector<16x16xi32>
    %27 = arith.cmpi ne, %25, %26 : vector<16x16xi32>
    %c0_i32_6 = arith.constant 0 : i32
    %28 = vector.broadcast %c0_i32_6 : i32 to vector<16x16xi32>
    %29 = arith.cmpi slt, %25, %28 : vector<16x16xi32>
    %c0_i32_7 = arith.constant 0 : i32
    %30 = arith.cmpi slt, %23, %c0_i32_7 : i32
    %31 = vector.broadcast %30 : i1 to vector<16x16xi1>
    %32 = vector.broadcast %31 : vector<16x16xi1> to vector<16x16xi1>
    %33 = arith.xori %29, %32 : vector<16x16xi1>
    %34 = arith.andi %33, %27 : vector<16x16xi1>
    %35 = vector.broadcast %23 : i32 to vector<16x16xi32>
    %36 = arith.addi %25, %35 : vector<16x16xi32>
    %37 = arith.select %34, %36, %25 : vector<16x16xi1>, vector<16x16xi32>
    %38 = tpu.iota {dimensions = array<i32: 1>} : vector<16x16xi32>
    %c2_i32_8 = arith.constant 2 : i32
    %c0_i32_9 = arith.constant 0 : i32
    %39 = arith.cmpi eq, %c2_i32_8, %c0_i32_9 : i32
    %c1_i32_10 = arith.constant 1 : i32
    %40 = arith.select %39, %c1_i32_10, %c2_i32_8 : i32
    %41 = vector.broadcast %40 : i32 to vector<16x16xi32>
    %42 = arith.remsi %38, %41 : vector<16x16xi32>
    %c0_i32_11 = arith.constant 0 : i32
    %43 = vector.broadcast %c0_i32_11 : i32 to vector<16x16xi32>
    %44 = arith.cmpi ne, %42, %43 : vector<16x16xi32>
    %c0_i32_12 = arith.constant 0 : i32
    %45 = vector.broadcast %c0_i32_12 : i32 to vector<16x16xi32>
    %46 = arith.cmpi slt, %42, %45 : vector<16x16xi32>
    %c0_i32_13 = arith.constant 0 : i32
    %47 = arith.cmpi slt, %40, %c0_i32_13 : i32
    %48 = vector.broadcast %47 : i1 to vector<16x16xi1>
    %49 = vector.broadcast %48 : vector<16x16xi1> to vector<16x16xi1>
    %50 = arith.xori %46, %49 : vector<16x16xi1>
    %51 = arith.andi %50, %44 : vector<16x16xi1>
    %52 = vector.broadcast %40 : i32 to vector<16x16xi32>
    %53 = arith.addi %42, %52 : vector<16x16xi32>
    %54 = arith.select %51, %53, %42 : vector<16x16xi1>, vector<16x16xi32>
    %55 = arith.cmpi eq, %37, %54 : vector<16x16xi32>
    %56 = vector.extract_strided_slice %16 {offsets = [0, 0], sizes = [16, 32], strides = [1, 1]} : vector<16x128xbf16> to vector<16x32xbf16>
    %57 = vector.extract_strided_slice %18 {offsets = [0, 0], sizes = [16, 32], strides = [1, 1]} : vector<16x128xbf16> to vector<16x32xbf16>
    %58 = vector.extract_strided_slice %20 {offsets = [0, 0], sizes = [16, 32], strides = [1, 1]} : vector<16x128xbf16> to vector<16x32xbf16>
    %cst_14 = arith.constant dense<0.000000e+00> : vector<16x16xf32>
    %59 = tpu.matmul %56, %57, %cst_14 {dimension_numbers = #tpu.dot_dimension_numbers<[1], [1], [0], [0], [0, 0, 1, 0], [], []>} : vector<16x32xbf16>, vector<16x32xbf16>, vector<16x16xf32> -> vector<16x16xf32>
    %cst_15 = arith.constant -1.000000e+30 : f32
    %60 = vector.broadcast %cst_15 : f32 to vector<16x16xf32>
    %61 = arith.select %55, %59, %60 : vector<16x16xi1>, vector<16x16xf32>
    %cst_16 = arith.constant dense<0xFF800000> : vector<16xf32>
    %62 = vector.multi_reduction <maximumf>, %61, %cst_16 [1] : vector<16x16xf32> to vector<16xf32>
    %63 = vector.shape_cast %62 : vector<16xf32> to vector<16x1xf32>
    %64 = vector.broadcast %63 : vector<16x1xf32> to vector<16x16xf32>
    %65 = arith.subf %61, %64 : vector<16x16xf32>
    %66 = math.exp %65 : vector<16x16xf32>
    %cst_17 = arith.constant dense<0.000000e+00> : vector<16xf32>
    %67 = vector.multi_reduction <add>, %66, %cst_17 [1] : vector<16x16xf32> to vector<16xf32>
    %68 = vector.shape_cast %67 : vector<16xf32> to vector<16x1xf32>
    %69 = tpu.reciprocal %68 {approx = true} : vector<16x1xf32> -> vector<16x1xf32>
    %70 = vector.broadcast %69 : vector<16x1xf32> to vector<16x16xf32>
    %71 = arith.mulf %66, %70 : vector<16x16xf32>
    %72 = arith.truncf %71 : vector<16x16xf32> to vector<16x16xbf16>
    %cst_18 = arith.constant dense<0.000000e+00> : vector<16x32xf32>
    %73 = tpu.matmul %72, %58, %cst_18 {dimension_numbers = #tpu.dot_dimension_numbers<[1], [0], [0], [1], [0, 0, 1, 1], [], []>} : vector<16x16xbf16>, vector<16x32xbf16>, vector<16x32xf32> -> vector<16x32xf32>
    %74 = arith.truncf %73 : vector<16x32xf32> to vector<16x32xbf16>
    %75 = vector.extract_strided_slice %16 {offsets = [0, 32], sizes = [16, 32], strides = [1, 1]} : vector<16x128xbf16> to vector<16x32xbf16>
    %76 = vector.extract_strided_slice %18 {offsets = [0, 32], sizes = [16, 32], strides = [1, 1]} : vector<16x128xbf16> to vector<16x32xbf16>
    %77 = vector.extract_strided_slice %20 {offsets = [0, 32], sizes = [16, 32], strides = [1, 1]} : vector<16x128xbf16> to vector<16x32xbf16>
    %cst_19 = arith.constant dense<0.000000e+00> : vector<16x16xf32>
    %78 = tpu.matmul %75, %76, %cst_19 {dimension_numbers = #tpu.dot_dimension_numbers<[1], [1], [0], [0], [0, 0, 1, 0], [], []>} : vector<16x32xbf16>, vector<16x32xbf16>, vector<16x16xf32> -> vector<16x16xf32>
    %cst_20 = arith.constant -1.000000e+30 : f32
    %79 = vector.broadcast %cst_20 : f32 to vector<16x16xf32>
    %80 = arith.select %55, %78, %79 : vector<16x16xi1>, vector<16x16xf32>
    %cst_21 = arith.constant dense<0xFF800000> : vector<16xf32>
    %81 = vector.multi_reduction <maximumf>, %80, %cst_21 [1] : vector<16x16xf32> to vector<16xf32>
    %82 = vector.shape_cast %81 : vector<16xf32> to vector<16x1xf32>
    %83 = vector.broadcast %82 : vector<16x1xf32> to vector<16x16xf32>
    %84 = arith.subf %80, %83 : vector<16x16xf32>
    %85 = math.exp %84 : vector<16x16xf32>
    %cst_22 = arith.constant dense<0.000000e+00> : vector<16xf32>
    %86 = vector.multi_reduction <add>, %85, %cst_22 [1] : vector<16x16xf32> to vector<16xf32>
    %87 = vector.shape_cast %86 : vector<16xf32> to vector<16x1xf32>
    %88 = tpu.reciprocal %87 {approx = true} : vector<16x1xf32> -> vector<16x1xf32>
    %89 = vector.broadcast %88 : vector<16x1xf32> to vector<16x16xf32>
    %90 = arith.mulf %85, %89 : vector<16x16xf32>
    %91 = arith.truncf %90 : vector<16x16xf32> to vector<16x16xbf16>
    %cst_23 = arith.constant dense<0.000000e+00> : vector<16x32xf32>
    %92 = tpu.matmul %91, %77, %cst_23 {dimension_numbers = #tpu.dot_dimension_numbers<[1], [0], [0], [1], [0, 0, 1, 1], [], []>} : vector<16x16xbf16>, vector<16x32xbf16>, vector<16x32xf32> -> vector<16x32xf32>
    %93 = arith.truncf %92 : vector<16x32xf32> to vector<16x32xbf16>
    %94 = vector.extract_strided_slice %16 {offsets = [0, 64], sizes = [16, 32], strides = [1, 1]} : vector<16x128xbf16> to vector<16x32xbf16>
    %95 = vector.extract_strided_slice %18 {offsets = [0, 64], sizes = [16, 32], strides = [1, 1]} : vector<16x128xbf16> to vector<16x32xbf16>
    %96 = vector.extract_strided_slice %20 {offsets = [0, 64], sizes = [16, 32], strides = [1, 1]} : vector<16x128xbf16> to vector<16x32xbf16>
    %cst_24 = arith.constant dense<0.000000e+00> : vector<16x16xf32>
    %97 = tpu.matmul %94, %95, %cst_24 {dimension_numbers = #tpu.dot_dimension_numbers<[1], [1], [0], [0], [0, 0, 1, 0], [], []>} : vector<16x32xbf16>, vector<16x32xbf16>, vector<16x16xf32> -> vector<16x16xf32>
    %cst_25 = arith.constant -1.000000e+30 : f32
    %98 = vector.broadcast %cst_25 : f32 to vector<16x16xf32>
    %99 = arith.select %55, %97, %98 : vector<16x16xi1>, vector<16x16xf32>
    %cst_26 = arith.constant dense<0xFF800000> : vector<16xf32>
    %100 = vector.multi_reduction <maximumf>, %99, %cst_26 [1] : vector<16x16xf32> to vector<16xf32>
    %101 = vector.shape_cast %100 : vector<16xf32> to vector<16x1xf32>
    %102 = vector.broadcast %101 : vector<16x1xf32> to vector<16x16xf32>
    %103 = arith.subf %99, %102 : vector<16x16xf32>
    %104 = math.exp %103 : vector<16x16xf32>
    %cst_27 = arith.constant dense<0.000000e+00> : vector<16xf32>
    %105 = vector.multi_reduction <add>, %104, %cst_27 [1] : vector<16x16xf32> to vector<16xf32>
    %106 = vector.shape_cast %105 : vector<16xf32> to vector<16x1xf32>
    %107 = tpu.reciprocal %106 {approx = true} : vector<16x1xf32> -> vector<16x1xf32>
    %108 = vector.broadcast %107 : vector<16x1xf32> to vector<16x16xf32>
    %109 = arith.mulf %104, %108 : vector<16x16xf32>
    %110 = arith.truncf %109 : vector<16x16xf32> to vector<16x16xbf16>
    %cst_28 = arith.constant dense<0.000000e+00> : vector<16x32xf32>
    %111 = tpu.matmul %110, %96, %cst_28 {dimension_numbers = #tpu.dot_dimension_numbers<[1], [0], [0], [1], [0, 0, 1, 1], [], []>} : vector<16x16xbf16>, vector<16x32xbf16>, vector<16x32xf32> -> vector<16x32xf32>
    %112 = arith.truncf %111 : vector<16x32xf32> to vector<16x32xbf16>
    %113 = vector.extract_strided_slice %16 {offsets = [0, 96], sizes = [16, 32], strides = [1, 1]} : vector<16x128xbf16> to vector<16x32xbf16>
    %114 = vector.extract_strided_slice %18 {offsets = [0, 96], sizes = [16, 32], strides = [1, 1]} : vector<16x128xbf16> to vector<16x32xbf16>
    %115 = vector.extract_strided_slice %20 {offsets = [0, 96], sizes = [16, 32], strides = [1, 1]} : vector<16x128xbf16> to vector<16x32xbf16>
    %cst_29 = arith.constant dense<0.000000e+00> : vector<16x16xf32>
    %116 = tpu.matmul %113, %114, %cst_29 {dimension_numbers = #tpu.dot_dimension_numbers<[1], [1], [0], [0], [0, 0, 1, 0], [], []>} : vector<16x32xbf16>, vector<16x32xbf16>, vector<16x16xf32> -> vector<16x16xf32>
    %cst_30 = arith.constant -1.000000e+30 : f32
    %117 = vector.broadcast %cst_30 : f32 to vector<16x16xf32>
    %118 = arith.select %55, %116, %117 : vector<16x16xi1>, vector<16x16xf32>
    %cst_31 = arith.constant dense<0xFF800000> : vector<16xf32>
    %119 = vector.multi_reduction <maximumf>, %118, %cst_31 [1] : vector<16x16xf32> to vector<16xf32>
    %120 = vector.shape_cast %119 : vector<16xf32> to vector<16x1xf32>
    %121 = vector.broadcast %120 : vector<16x1xf32> to vector<16x16xf32>
    %122 = arith.subf %118, %121 : vector<16x16xf32>
    %123 = math.exp %122 : vector<16x16xf32>
    %cst_32 = arith.constant dense<0.000000e+00> : vector<16xf32>
    %124 = vector.multi_reduction <add>, %123, %cst_32 [1] : vector<16x16xf32> to vector<16xf32>
    %125 = vector.shape_cast %124 : vector<16xf32> to vector<16x1xf32>
    %126 = tpu.reciprocal %125 {approx = true} : vector<16x1xf32> -> vector<16x1xf32>
    %127 = vector.broadcast %126 : vector<16x1xf32> to vector<16x16xf32>
    %128 = arith.mulf %123, %127 : vector<16x16xf32>
    %129 = arith.truncf %128 : vector<16x16xf32> to vector<16x16xbf16>
    %cst_33 = arith.constant dense<0.000000e+00> : vector<16x32xf32>
    %130 = tpu.matmul %129, %115, %cst_33 {dimension_numbers = #tpu.dot_dimension_numbers<[1], [0], [0], [1], [0, 0, 1, 1], [], []>} : vector<16x16xbf16>, vector<16x32xbf16>, vector<16x32xf32> -> vector<16x32xf32>
    %131 = arith.truncf %130 : vector<16x32xf32> to vector<16x32xbf16>
    %132 = tpu.concatenate %74, %93, %112, %131 in 1 : vector<16x32xbf16>, vector<16x32xbf16>, vector<16x32xbf16>, vector<16x32xbf16> -> vector<16x128xbf16>
    %c0_34 = arith.constant 0 : index
    %c0_35 = arith.constant 0 : index
    %133 = vector.load %arg3[%c0_34, %c0_35] : memref<128x128xbf16, #tpu.memory_space<vmem>>, vector<128x128xbf16>
    %cst_36 = arith.constant dense<0.000000e+00> : vector<16x128xf32>
    %134 = tpu.matmul %132, %133, %cst_36 {dimension_numbers = #tpu.dot_dimension_numbers<[1], [0], [0], [1], [0, 0, 1, 1], [], []>} : vector<16x128xbf16>, vector<128x128xbf16>, vector<16x128xf32> -> vector<16x128xf32>
    %135 = vector.broadcast %5 : vector<1x128xf32> to vector<16x128xf32>
    %136 = arith.addf %134, %135 : vector<16x128xf32>
    %137 = arith.addf %0, %136 : vector<16x128xf32>
    %cst_37 = arith.constant dense<0.000000e+00> : vector<16xf32>
    %138 = vector.multi_reduction <add>, %137, %cst_37 [1] : vector<16x128xf32> to vector<16xf32>
    %139 = vector.shape_cast %138 : vector<16xf32> to vector<16x1xf32>
    %cst_38 = arith.constant 1.280000e+02 : f32
    %140 = vector.broadcast %cst_38 : f32 to vector<16x1xf32>
    %141 = arith.divf %139, %140 : vector<16x1xf32>
    %142 = vector.broadcast %141 : vector<16x1xf32> to vector<16x128xf32>
    %143 = arith.subf %137, %142 : vector<16x128xf32>
    %144 = arith.mulf %143, %143 : vector<16x128xf32>
    %cst_39 = arith.constant dense<0.000000e+00> : vector<16xf32>
    %145 = vector.multi_reduction <add>, %144, %cst_39 [1] : vector<16x128xf32> to vector<16xf32>
    %146 = vector.shape_cast %145 : vector<16xf32> to vector<16x1xf32>
    %cst_40 = arith.constant 1.280000e+02 : f32
    %147 = vector.broadcast %cst_40 : f32 to vector<16x1xf32>
    %148 = arith.divf %146, %147 : vector<16x1xf32>
    %149 = vector.broadcast %141 : vector<16x1xf32> to vector<16x128xf32>
    %150 = arith.subf %137, %149 : vector<16x128xf32>
    %cst_41 = arith.constant 9.99999974E-6 : f32
    %151 = vector.broadcast %cst_41 : f32 to vector<16x1xf32>
    %152 = arith.addf %148, %151 : vector<16x1xf32>
    %153 = math.rsqrt %152 : vector<16x1xf32>
    %154 = vector.broadcast %153 : vector<16x1xf32> to vector<16x128xf32>
    %155 = arith.mulf %150, %154 : vector<16x128xf32>
    %156 = vector.broadcast %6 : vector<1x128xf32> to vector<16x128xf32>
    %157 = arith.mulf %155, %156 : vector<16x128xf32>
    %158 = vector.broadcast %7 : vector<1x128xf32> to vector<16x128xf32>
    %159 = arith.addf %157, %158 : vector<16x128xf32>
    %160 = arith.truncf %159 : vector<16x128xf32> to vector<16x128xbf16>
    %c0_42 = arith.constant 0 : index
    %c0_43 = arith.constant 0 : index
    %161 = vector.load %arg4[%c0_42, %c0_43] : memref<128x256xbf16, #tpu.memory_space<vmem>>, vector<128x256xbf16>
    %cst_44 = arith.constant dense<0.000000e+00> : vector<16x256xf32>
    %162 = tpu.matmul %160, %161, %cst_44 {dimension_numbers = #tpu.dot_dimension_numbers<[1], [0], [0], [1], [0, 0, 1, 1], [], []>} : vector<16x128xbf16>, vector<128x256xbf16>, vector<16x256xf32> -> vector<16x256xf32>
    %163 = vector.broadcast %4 : vector<1x256xf32> to vector<16x256xf32>
    %164 = arith.addf %162, %163 : vector<16x256xf32>
    %cst_45 = arith.constant 0.000000e+00 : f32
    %165 = vector.broadcast %cst_45 : f32 to vector<16x256xf32>
    %166 = arith.maximumf %164, %165 : vector<16x256xf32>
    %167 = arith.truncf %166 : vector<16x256xf32> to vector<16x256xbf16>
    %c0_46 = arith.constant 0 : index
    %c0_47 = arith.constant 0 : index
    %168 = vector.load %arg5[%c0_46, %c0_47] : memref<256x128xbf16, #tpu.memory_space<vmem>>, vector<256x128xbf16>
    %cst_48 = arith.constant dense<0.000000e+00> : vector<16x128xf32>
    %169 = tpu.matmul %167, %168, %cst_48 {dimension_numbers = #tpu.dot_dimension_numbers<[1], [0], [0], [1], [0, 0, 1, 1], [], []>} : vector<16x256xbf16>, vector<256x128xbf16>, vector<16x128xf32> -> vector<16x128xf32>
    %170 = vector.broadcast %8 : vector<1x128xf32> to vector<16x128xf32>
    %171 = arith.addf %169, %170 : vector<16x128xf32>
    %172 = arith.addf %159, %171 : vector<16x128xf32>
    %cst_49 = arith.constant dense<0.000000e+00> : vector<16xf32>
    %173 = vector.multi_reduction <add>, %172, %cst_49 [1] : vector<16x128xf32> to vector<16xf32>
    %174 = vector.shape_cast %173 : vector<16xf32> to vector<16x1xf32>
    %cst_50 = arith.constant 1.280000e+02 : f32
    %175 = vector.broadcast %cst_50 : f32 to vector<16x1xf32>
    %176 = arith.divf %174, %175 : vector<16x1xf32>
    %177 = vector.broadcast %176 : vector<16x1xf32> to vector<16x128xf32>
    %178 = arith.subf %172, %177 : vector<16x128xf32>
    %179 = arith.mulf %178, %178 : vector<16x128xf32>
    %cst_51 = arith.constant dense<0.000000e+00> : vector<16xf32>
    %180 = vector.multi_reduction <add>, %179, %cst_51 [1] : vector<16x128xf32> to vector<16xf32>
    %181 = vector.shape_cast %180 : vector<16xf32> to vector<16x1xf32>
    %cst_52 = arith.constant 1.280000e+02 : f32
    %182 = vector.broadcast %cst_52 : f32 to vector<16x1xf32>
    %183 = arith.divf %181, %182 : vector<16x1xf32>
    %184 = vector.broadcast %176 : vector<16x1xf32> to vector<16x128xf32>
    %185 = arith.subf %172, %184 : vector<16x128xf32>
    %cst_53 = arith.constant 9.99999974E-6 : f32
    %186 = vector.broadcast %cst_53 : f32 to vector<16x1xf32>
    %187 = arith.addf %183, %186 : vector<16x1xf32>
    %188 = math.rsqrt %187 : vector<16x1xf32>
    %189 = vector.broadcast %188 : vector<16x1xf32> to vector<16x128xf32>
    %190 = arith.mulf %185, %189 : vector<16x128xf32>
    %191 = vector.broadcast %9 : vector<1x128xf32> to vector<16x128xf32>
    %192 = arith.mulf %190, %191 : vector<16x128xf32>
    %193 = vector.broadcast %10 : vector<1x128xf32> to vector<16x128xf32>
    %194 = arith.addf %192, %193 : vector<16x128xf32>
    %c0_54 = arith.constant 0 : index
    %c0_55 = arith.constant 0 : index
    %195 = vector.load %arg7[%c0_54, %c0_55] : memref<16x128xf32, #tpu.memory_space<vmem>>, vector<16x128xf32>
    tpu.vector_store %arg7[%c0_54, %c0_55], %194 {strides = array<i32>} : memref<16x128xf32, #tpu.memory_space<vmem>>, vector<16x128xf32>,
    return
  }
  func.func @transform_0(%arg0: i32) -> (i32, i32) {
    %c0_i32 = arith.constant 0 : i32
    %c0_i32_0 = arith.constant 0 : i32
    %c0_i32_1 = arith.constant 0 : i32
    return %c0_i32, %c0_i32_0 : i32, i32
  }
  func.func @transform_1(%arg0: i32) -> (i32, i32) {
    %c0_i32 = arith.constant 0 : i32
    %c0_i32_0 = arith.constant 0 : i32
    %c0_i32_1 = arith.constant 0 : i32
    return %c0_i32, %c0_i32_0 : i32, i32
  }
  func.func @transform_2(%arg0: i32) -> (i32, i32) {
    %c0_i32 = arith.constant 0 : i32
    %c0_i32_0 = arith.constant 0 : i32
    %c0_i32_1 = arith.constant 0 : i32
    return %c0_i32, %c0_i32_0 : i32, i32
  }
  func.func @transform_3(%arg0: i32) -> (i32, i32) {
    %c0_i32 = arith.constant 0 : i32
    %c0_i32_0 = arith.constant 0 : i32
    %c0_i32_1 = arith.constant 0 : i32
    return %c0_i32, %c0_i32_0 : i32, i32
  }
  func.func @transform_4(%arg0: i32) -> (i32, i32) {
    %c0_i32 = arith.constant 0 : i32
    %c0_i32_0 = arith.constant 0 : i32
    %c0_i32_1 = arith.constant 0 : i32
    return %c0_i32, %c0_i32_0 : i32, i32
  }
  func.func @transform_5(%arg0: i32) -> (i32, i32) {
    %c0_i32 = arith.constant 0 : i32
    %c0_i32_0 = arith.constant 0 : i32
    %c0_i32_1 = arith.constant 0 : i32
    return %c0_i32, %c0_i32_0 : i32, i32
  }
  func.func @transform_6(%arg0: i32) -> (i32, i32) {
    %c0_i32 = arith.constant 0 : i32
    %c0_i32_0 = arith.constant 0 : i32
    %c0_i32_1 = arith.constant 0 : i32
    return %c0_i32, %c0_i32_0 : i32, i32
  }
}

</mosaic_0001>

<bundles_post_ra>
// kernel: transformer_block.1
= control target key start
LH: loop header
LB: loop body
LE: loop exit
PB: predicated region body
PF: predicated region fallthrough
CT: control target
= control target key end

     0   :  { %v1742_v2 = vmov 0   ;;  %v1743_v3 = vmov 0.0   ;;  %s2175_s0 = inlined_call_operand.vmem [shape: f32[16,128], index: 0, kind: input, shape index: {}]   ;;  %s2176_s1 = inlined_call_operand.vmem [shape: bf16[128,384], index: 1, kind: input, shape index: {}]   ;;  %s2177_s2 = inlined_call_operand.vmem [shape: bf16[128,128], index: 2, kind: input, shape index: {}]   ;;  %s2178_s3 = inlined_call_operand.vmem [shape: bf16[128,256], index: 3, kind: input, shape index: {}]   ;;  %s2179_s4 = inlined_call_operand.vmem [shape: bf16[256,128], index: 4, kind: input, shape index: {}]   ;;  %s2180_s5 = inlined_call_operand.vmem [shape: f32[8,384], index: 5, kind: input, shape index: {}]   ;;  %s2181_s6 = inlined_call_operand.hbm [shape: f32[16,128], index: 6, kind: output, shape index: {}]  }
   0x1   :  { %v1598_v0 = vld [vmem:[%s2176_s1 + $0x4] ss:$12 sps:$4 sm:$0xff]   ;;  %v1600_v1 = vld [vmem:[%s2176_s1] ss:$12 sps:$4 sm:$0xff]   ;;  %235 = vmatprep.mubr.bf16.mxu0 %v1742_v2  ;;  %1501 = vmatprep.subr.bf16.mxu1 %v1743_v3  ;;  %v1601_v4 = vld [vmem:[%s2176_s1 + $0x1c] ss:$12 sps:$4 sm:$0xff]  }
   0x2   :  { %203 = vmatprep.subr.bf16.mxu0 %v1598_v0  ;;  %v1603_v5 = vld [vmem:[%s2176_s1 + $0x18] ss:$12 sps:$4 sm:$0xff]   ;;  %v1604_v6 = vld [vmem:[%s2176_s1 + $0x34] ss:$12 sps:$4 sm:$0xff]   ;;  %v1606_v7 = vld [vmem:[%s2176_s1 + $0x30] ss:$12 sps:$4 sm:$0xff]  }
   0x3   :  { %204 = vmatpush1.bf16.msra.mxu0 %v1600_v1  ;;  %v1607_v8 = vld [vmem:[%s2176_s1 + $0x4c] ss:$12 sps:$4 sm:$0xff]   ;;  %v1609_v9 = vld [vmem:[%s2176_s1 + $0x48] ss:$12 sps:$4 sm:$0xff]   ;;  %v1610_v10 = vld [vmem:[%s2176_s1 + $0x64] ss:$12 sps:$4 sm:$0xff]  }
   0x4   :  { %205 = vmatprep.subr.bf16.mxu0 %v1601_v4  ;;  %v1622_v11 = vld [vmem:[%s2176_s1 + $0x8] ss:$12 sps:$4 sm:$0xff]   ;;  %v1623_v12 = vld [vmem:[%s2176_s1 + $0x20] ss:$12 sps:$4 sm:$0xff]   ;;  %v1615_v15 = vld [vmem:[%s2176_s1 + $0x78] ss:$12 sps:$4 sm:$0xff]  }
   0x5   :  { %1502 = vmatpush3.bf16.msra.mxu1 %v1622_v11  ;;  %v1612_v13 = vld [vmem:[%s2176_s1 + $0x60] ss:$12 sps:$4 sm:$0xff]   ;;  %v1613_v14 = vld [vmem:[%s2176_s1 + $0x7c] ss:$12 sps:$4 sm:$0xff]   ;;  %v1624_v17 = vld [vmem:[%s2176_s1 + $0x38] ss:$12 sps:$4 sm:$0xff]  }
   0x6   :  { %1503 = vmatprep.subr.bf16.mxu1 %v1743_v3  ;;  %v1616_v16 = vld [vmem:[%s2176_s1 + $0x94] ss:$12 sps:$4 sm:$0xff]   ;;  %v1625_v18 = vld [vmem:[%s2176_s1 + $0x50] ss:$12 sps:$4 sm:$0xff]   ;;  %v1619_v20 = vld [vmem:[%s2176_s1 + $0xac] ss:$12 sps:$4 sm:$0xff]  }
   0x7   :  { %206 = vmatpush1.bf16.msra.mxu0 %v1603_v5  ;;  %v1618_v19 = vld [vmem:[%s2176_s1 + $0x90] ss:$12 sps:$4 sm:$0xff]   ;;  %v1626_v21 = vld [vmem:[%s2176_s1 + $0x68] ss:$12 sps:$4 sm:$0xff]   ;;  %v1857_v23 = vld [vmem:[%s2175_s0] sm:$0xff] }
   0x8   :  { %207 = vmatprep.subr.bf16.mxu0 %v1604_v6  ;;  %v1621_v22 = vld [vmem:[%s2176_s1 + $0xa8] ss:$12 sps:$4 sm:$0xff]   ;;  %v1627_v25 = vld [vmem:[%s2176_s1 + $0x80] ss:$12 sps:$4 sm:$0xff]   ;;  %v1628_v27 = vld [vmem:[%s2176_s1 + $0x98] ss:$12 sps:$4 sm:$0xff]  }
   0x9   :  { %1504 = vmatpush3.bf16.msra.mxu1 %v1623_v12  ;;  %v1862_v24 = vld [vmem:[%s2175_s0 + $0x8] sm:$0xff] }
   0xa   :  { %1505 = vmatprep.subr.bf16.mxu1 %v1743_v3  ;;  %v27_v26 = vpack.c.bf16 %v1862_v24, %v1857_v23 }
   0xb   :  { %208 = vmatpush1.bf16.msra.mxu0 %v1606_v7 }
   0xc   :  { %209 = vmatprep.subr.bf16.mxu0 %v1607_v8 }
   0xd   :  { %1506 = vmatpush3.bf16.msra.mxu1 %v1624_v17 }
   0xe   :  { %1507 = vmatprep.subr.bf16.mxu1 %v1743_v3 }
   0xf   :  { %210 = vmatpush1.bf16.msra.mxu0 %v1609_v9 }
  0x10   :  { %211 = vmatprep.subr.bf16.mxu0 %v1610_v10 }
  0x11   :  { %1508 = vmatpush3.bf16.msra.mxu1 %v1625_v18 }
  0x12   :  { %1509 = vmatprep.subr.bf16.mxu1 %v1743_v3 }
  0x13   :  { %212 = vmatpush1.bf16.msra.mxu0 %v1612_v13 }
  0x14   :  { %213 = vmatprep.subr.bf16.mxu0 %v1613_v14 }
  0x15   :  { %1510 = vmatpush3.bf16.msra.mxu1 %v1626_v21 }
  0x16   :  { %1511 = vmatprep.subr.bf16.mxu1 %v1743_v3 }
  0x17   :  { %214 = vmatpush1.bf16.msra.mxu0 %v1615_v15 }
  0x18   :  { %215 = vmatprep.subr.bf16.mxu0 %v1616_v16 }
  0x19   :  { %1512 = vmatpush3.bf16.msra.mxu1 %v1627_v25 }
  0x1a   :  { %1513 = vmatprep.subr.bf16.mxu1 %v1743_v3 }
  0x1b   :  { %216 = vmatpush1.bf16.msra.mxu0 %v1618_v19 }
  0x1c   :  { %217 = vmatprep.subr.bf16.mxu0 %v1619_v20 }
  0x1d   :  { %1514 = vmatpush3.bf16.msra.mxu1 %v1628_v27 }
  0x1e   :  { %1515 = vmatprep.subr.bf16.mxu1 %v1743_v3 }
  0x1f   :  { %218 = vmatpush1.bf16.msra.mxu0 %v1621_v22 }
  0x20   :  { %1545 = vmatprep.subr.bf16.mxu0 %v1743_v3 }
  0x22   :  { %236 = vmatmul.mubr.bf16.vlgmr.msra.gmra.mrb[0].mxu0 %v27_v26 }
  0x23   :  { %11 = vsyncpa [#allocation3], 0  ;;  %v1629_v28 = vld [vmem:[%s2176_s1 + $0xb0] ss:$12 sps:$4 sm:$0xff]   ;;  %vm1744_vm0 = vmmov 0   ;;  %v63_v29 = vlaneseq  ;;  %v1893_v32 = vld [vmem:[%s2180_s5] sm:$0xff] }
  0x24   :  { %1516 = vmatpush3.bf16.msra.mxu1 %v1629_v28  ;;  %1517 = vmatprep.mubr.msk.bf16.mxu1 %vm1744_vm0, %v1743_v3  ;;  %v1898_v33 = vld [vmem:[%s2180_s5 + $0x8] sm:$0xff]  ;;  %vm333_vm1 = vcmask 261120   ;;  %v30_v47 = vld [vmem:[%s2180_s5 + $0x10] sm:$0xff]  ;;  %vm383_vm3 = vcmask 130048   ;;  %s1745_s5 = smov 96   ;;  %s1746_s29 = smov 32  }
  0x25   :  { %1521 = vmatprep.subr.bf16.mxu1 %v1743_v3  ;;  %1547 = vmatprep.mubr.msk.bf16.mxu0 %vm1744_vm0, %v1743_v3  ;;  %v1887_v30 = vshrl.u32 %v63_v29, 7  ;;  %v318_v56 = vand.u32 127, %v63_v29  ;;  %s1747_s30 = smov 64   ;;  %vm839_vm5 = vcmask 523264   ;;  %vm842_vm6 = vcmask 785408  }
  0x27   :  { %1518 = vmatmul.mubr.bf16.vlgmr.msra.gmra.mrb[0].mxu1 %v27_v26  ;;  %v65_v31 = vsub.s32 0, %v1887_v30  ;;  %v292_v57 = vadd.s32 8, %v1887_v30  ;;  %v297_v58 = vand.u32 1, %v1887_v30  ;;  %v323_v59 = vand.u32 1, %v318_v56 }
  0x28   :  { %1523 = vmatprep.mubr.msk.bf16.mxu1 %vm1744_vm0, %v1743_v3 }
  0x29   :  { %v66_v34 = vrot.slane %v1893_v32, %v65_v31  ;;  %v70_v36 = vrot.slane %v1898_v33, %v65_v31  ;;  %v74_v48 = vrot.slane %v30_v47, %v65_v31  ;;  %v304_v60 = vand.u32 1, %v292_v57 }
  0x2a   :  { %vm1916_vm2 = vcmp.eq.s32.totalorder %v297_v58, %v323_v59 }
  0x2b   :  { %vm1920_vm4 = vcmp.eq.s32.totalorder %v304_v60, %v323_v59 }
  0xf5   :  { %v237_v35 = vpop.f32.mrb[0].mxu0 }
  0xf6   :  { %v239_v37 = vpop.f32.mrb[1].mxu0  ;;  %v238_v39 = vadd.f32 %v237_v35, %v66_v34 }
  0xf7   :  { %v241_v38 = vpop.f32.mrb[2].mxu0  ;;  %v240_v42 = vadd.f32 %v239_v37, %v70_v36 }
  0xf8   :  { %v242_v40 = vadd.f32 %v241_v38, %v66_v34  ;;  %v243_v41 = vpop.f32.mrb[3].mxu0 }
  0xf9   :  { %v244_v43 = vadd.f32 %v243_v41, %v70_v36 }
  0xfa   :  { %v287_v44 = vpack.c.bf16 %v242_v40, %v238_v39  ;;  %v280_v49 = vpop.f32.mrb[0].mxu1 }
  0xfb   :  { %v288_v45 = vpack.c.bf16 %v244_v43, %v240_v42  ;;  %v281_v50 = vadd.f32 %v280_v49, %v74_v48  ;;  %v1519_v51 = vpop.f32.mrb[1].mxu1 }
  0xfc   :  { %v283_v52 = vpop.f32.mrb[2].mxu1 }
  0xfd   :  { %v338_v46 = vsel %vm333_vm1, %v288_v45, 0  ;;  %v284_v53 = vadd.f32 %v283_v52, %v74_v48  ;;  %v1520_v54 = vpop.f32.mrb[3].mxu1 }
  0xfe   :  { %1522 = vmatpush3.bf16.xpose.msra.mxu1 %v338_v46 }
  0xff   :  { %1527 = vmatprep.subr.bf16.mxu1 %v1743_v3  ;;  %v1910_v55 = vpack.c.bf16 %v284_v53, %v281_v50 }
 0x105   :  { %1524 = vmatmul.mubr.msk.bf16.vlgmr.msra.gmra.mrb[4].mxu1 %vm333_vm1, %v287_v44 }
 0x106   :  { %1529 = vmatprep.mubr.msk.bf16.mxu1 %vm1744_vm0, %v1743_v3  ;;  %1528 = vmatpush3.bf16.msra.mxu1 %v1910_v55 }
 0x107   :  { %1533 = vmatprep.subr.bf16.mxu1 %v1743_v3 }
 0x1d8   :  { %v374_v62 = vpop.f32.mrb[4].mxu1 }
 0x1d9   :  { %v381_v0 = vsel %vm1916_vm2, %v374_v62, -1e+30  ;;  %v1525_v1 = vpop.f32.mrb[5].mxu1 }
 0x1da   :  { %v377_v4 = vpop.f32.mrb[6].mxu1  ;;  %v384_v5 = vsel %vm383_vm3, %v381_v0, -inf }
 0x1db   :  { %v382_v6 = vsel %vm1920_vm4, %v377_v4, -1e+30  ;;  %385 = vmax.xlane.f32.xlu0 %v384_v5  ;;  %v1526_v7 = vpop.f32.mrb[7].mxu1 }
 0x1dc   :  { %v387_v8 = vsel %vm383_vm3, %v382_v6, -inf }
 0x1df   :  { %388 = vmax.xlane.f32.xlu0 %v387_v8 }
 0x1f5   :  { %456 = vrot.lane.b32.xlu0 %v288_v45, %s1745_s5 }
 0x1f9   :  { %705 = vrot.lane.b32.xlu0 %v288_v45, %s1746_s29 }
 0x268   :  { %v386_v9 = vpop.xlane.xlu0 %385 }
 0x269   :  { %v390_v10 = vsub.f32 %v381_v0, %v386_v9 }
 0x26b   :  { %v392_v11 = vmul.f32 1.442695, %v390_v10 }
 0x26c   :  { %v389_v12 = vpop.xlane.xlu0 %388 }
 0x26d   :  { %1678 = vpow2.f32 %v392_v11  ;;  %v391_v13 = vsub.f32 %v382_v6, %v389_v12 }
 0x26f   :  { %v394_v14 = vmul.f32 1.442695, %v391_v13 }
 0x270   :  { %v457_v22 = vpop.permute.xlu0 %456 }
 0x271   :  { %1680 = vpow2.f32 %v394_v14  ;;  %v462_v36 = vsel %vm333_vm1, %v457_v22, 0 }
 0x274   :  { %v706_v34 = vpop.permute.xlu0 %705 }
 0x275   :  { %v711_v38 = vsel %vm333_vm1, %v706_v34, 0 }
 0x277   :  { %v1679_v15 = vpop.eup %1678 }
 0x278   :  { %v396_v16 = vsel %vm383_vm3, %v1679_v15, 0.0 }
 0x279   :  { %397 = vadd.xlane.f32.xlu1 %v396_v16 }
 0x27b   :  { %v1681_v17 = vpop.eup %1680 }
 0x27c   :  { %v399_v18 = vsel %vm383_vm3, %v1681_v17, 0.0 }
 0x27d   :  { %400 = vadd.xlane.f32.xlu1 %v399_v18 }
 0x28e   :  { %453 = vrot.lane.b32.xlu1 %v287_v44, %s1745_s5 }
 0x292   :  { %581 = vrot.lane.b32.xlu1 %v288_v45, %s1747_s30 }
 0x296   :  { %579 = vrot.lane.b32.xlu1 %v287_v44, %s1747_s30 }
 0x29a   :  { %703 = vrot.lane.b32.xlu1 %v287_v44, %s1746_s29 }
 0x306   :  { %v398_v19 = vpop.xlane.xlu1 %397 }
 0x307   :  { %1682 = vrcp.f32 %v398_v19 }
 0x30a   :  { %v401_v20 = vpop.xlane.xlu1 %400 }
 0x30b   :  { %1684 = vrcp.f32 %v401_v20 }
 0x30e   :  { %v454_v21 = vpop.permute.xlu1 %453 }
 0x311   :  { %v1683_v26 = vpop.eup %1682 }
 0x312   :  { %v582_v25 = vpop.permute.xlu1 %581  ;;  %v404_v29 = vmul.f32 %v1683_v26, %v1679_v15 }
 0x313   :  { %v587_v27 = vsel %vm333_vm1, %v582_v25, 0 }
 0x314   :  { %1546 = vmatpush3.bf16.xpose.msra.mxu0 %v587_v27 }
 0x315   :  { %v1685_v28 = vpop.eup %1684  ;;  %1557 = vmatprep.subr.bf16.mxu0 %v1743_v3 }
 0x316   :  { %v405_v31 = vmul.f32 %v1685_v28, %v1681_v17  ;;  %v580_v37 = vpop.permute.xlu1 %579 }
 0x318   :  { %v406_v35 = vpack.c.bf16 %v405_v31, %v404_v29 }
 0x31a   :  { %1530 = vmatmul.mubr.msk.bf16.vlgmr.msra.gmra.mrb[8].mxu1 %vm383_vm3, %v406_v35  ;;  %v704_v39 = vpop.permute.xlu1 %703 }
 0x31b   :  { %1534 = vmatpush3.bf16.xpose.msra.mxu1 %v462_v36  ;;  %1548 = vmatmul.mubr.msk.bf16.vlgmr.msra.gmra.mrb[4].mxu0 %vm333_vm1, %v580_v37 }
 0x31c   :  { %1558 = vmatpush3.bf16.xpose.msra.mxu0 %v711_v38  ;;  %1535 = vmatprep.mubr.msk.bf16.mxu1 %vm1744_vm0, %v1743_v3 }
 0x31d   :  { %1559 = vmatprep.mubr.msk.bf16.mxu0 %vm1744_vm0, %v1743_v3  ;;  %1539 = vmatprep.subr.bf16.mxu1 %v1743_v3 }
 0x31e   :  { %1569 = vmatprep.subr.bf16.mxu0 %v1743_v3 }
 0x322   :  { %1536 = vmatmul.mubr.msk.bf16.vlgmr.msra.gmra.mrb[12].mxu1 %vm333_vm1, %v454_v21 }
 0x323   :  { %1560 = vmatmul.mubr.msk.bf16.vlgmr.msra.gmra.mrb[8].mxu0 %vm333_vm1, %v704_v39  ;;  %1541 = vmatprep.mubr.msk.bf16.mxu1 %vm1744_vm0, %v1743_v3 }
 0x324   :  { %1585 = vmatprep.mubr.msk.bf16.mxu0 %vm1744_vm0, %v1743_v3 }
 0x3ed   :  { %v1956_v40 = vpop.f32.mrb[8].mxu1 }
 0x3ee   :  { %v1531_v41 = vpop.f32.mrb[9].mxu1  ;;  %v623_v42 = vpop.f32.mrb[4].mxu0 }
 0x3ef   :  { %v1958_v43 = vpop.f32.mrb[10].mxu1  ;;  %v1549_v44 = vpop.f32.mrb[5].mxu0  ;;  %v630_v57 = vsel %vm1916_vm2, %v623_v42, -1e+30 }
 0x3f0   :  { %v451_v45 = vpack.c.bf16 %v1958_v43, %v1956_v40  ;;  %v1532_v46 = vpop.f32.mrb[11].mxu1  ;;  %v626_v47 = vpop.f32.mrb[6].mxu0  ;;  %v632_v4 = vsel %vm383_vm3, %v630_v57, -inf  ;;  %v1638_v43 = vld [vmem:[%s2178_s3] ss:$8 sps:$4 sm:$0xff]  }
 0x3f1   :  { %v1550_v48 = vpop.f32.mrb[7].mxu0  ;;  %v631_v5 = vsel %vm1920_vm4, %v626_v47, -1e+30 }
 0x3f2   :  { %v635_v7 = vsel %vm383_vm3, %v631_v5, -inf }
 0x3f5   :  { %v498_v49 = vpop.f32.mrb[12].mxu1 }
 0x3f6   :  { %v505_v50 = vsel %vm1916_vm2, %v498_v49, -1e+30  ;;  %v1537_v51 = vpop.f32.mrb[13].mxu1  ;;  %v747_v52 = vpop.f32.mrb[8].mxu0 }
 0x3f7   :  { %v501_v53 = vpop.f32.mrb[14].mxu1  ;;  %v1561_v54 = vpop.f32.mrb[9].mxu0  ;;  %v507_v56 = vsel %vm383_vm3, %v505_v50, -inf  ;;  %v754_v8 = vsel %vm1916_vm2, %v747_v52, -1e+30 }
 0x3f8   :  { %v506_v58 = vsel %vm1920_vm4, %v501_v53, -1e+30  ;;  %v750_v59 = vpop.f32.mrb[10].mxu0  ;;  %508 = vmax.xlane.f32.xlu0 %v507_v56  ;;  %v1538_v60 = vpop.f32.mrb[15].mxu1  ;;  %v756_v9 = vsel %vm383_vm3, %v754_v8, -inf }
 0x3f9   :  { %v1562_v62 = vpop.f32.mrb[11].mxu0  ;;  %v510_v0 = vsel %vm383_vm3, %v506_v58, -inf  ;;  %v755_v1 = vsel %vm1920_vm4, %v750_v59, -1e+30 }
 0x3fa   :  { %511 = vmax.xlane.f32.xlu1 %v510_v0  ;;  %v759_v6 = vsel %vm383_vm3, %v755_v1, -inf }
 0x3fc   :  { %633 = vmax.xlane.f32.xlu0 %v632_v4 }
 0x3fe   :  { %760 = vmax.xlane.f32.xlu1 %v759_v6 }
 0x400   :  { %636 = vmax.xlane.f32.xlu0 %v635_v7 }
 0x404   :  { %757 = vmax.xlane.f32.xlu0 %v756_v9 }
 0x485   :  { %v509_v10 = vpop.xlane.xlu0 %508 }
 0x486   :  { %v513_v18 = vsub.f32 %v505_v50, %v509_v10  ;;  %v1630_v10 = vld [vmem:[%s2177_s2] sm:$0xff]  }
 0x487   :  { %v512_v11 = vpop.xlane.xlu1 %511  ;;  %1570 = vmatpush3.bf16.msra.mxu0 %v1630_v10  ;;  %v1661_v10 = vld [vmem:[%s2178_s3 + $0x74] ss:$8 sps:$4 sm:$0xff]  }
 0x488   :  { %v514_v19 = vsub.f32 %v506_v58, %v512_v11  ;;  %v515_v25 = vmul.f32 1.442695, %v513_v18  ;;  %v1631_v11 = vld [vmem:[%s2177_s2 + $0x8] sm:$0xff]   ;;  %1571 = vmatprep.subr.bf16.mxu0 %v1743_v3  ;;  %v1637_v18 = vld [vmem:[%s2177_s2 + $0x38] sm:$0xff]  }
 0x489   :  { %v634_v12 = vpop.xlane.xlu0 %633 }
 0x48a   :  { %v638_v13 = vsub.f32 %v630_v57, %v634_v12  ;;  %v517_v26 = vmul.f32 1.442695, %v514_v19  ;;  %v1632_v12 = vld [vmem:[%s2177_s2 + $0x10] sm:$0xff]  }
 0x48b   :  { %v761_v14 = vpop.xlane.xlu1 %760  ;;  %1572 = vmatpush3.bf16.msra.mxu0 %v1631_v11  ;;  %v1659_v11 = vld [vmem:[%s2178_s3 + $0x70] ss:$8 sps:$4 sm:$0xff]  }
 0x48c   :  { %v640_v63 = vmul.f32 1.442695, %v638_v13  ;;  %v763_v15 = vsub.f32 %v755_v1, %v761_v14  ;;  %1573 = vmatprep.subr.bf16.mxu0 %v1743_v3  ;;  %v1634_v13 = vld [vmem:[%s2177_s2 + $0x20] sm:$0xff]   ;;  %v1635_v14 = vld [vmem:[%s2177_s2 + $0x28] sm:$0xff]  }
 0x48d   :  { %v637_v16 = vpop.xlane.xlu0 %636 }
 0x48e   :  { %1686 = vpow2.f32 %v640_v63  ;;  %v639_v17 = vsub.f32 %v631_v5, %v637_v16  ;;  %v766_v20 = vmul.f32 1.442695, %v763_v15  ;;  %v1636_v15 = vld [vmem:[%s2177_s2 + $0x30] sm:$0xff]  }
 0x48f   :  { %1574 = vmatpush3.bf16.msra.mxu0 %v1632_v12  ;;  %v1662_v12 = vld [vmem:[%s2179_s4 + $0x40] sm:$0xff]  }
 0x490   :  { %v642_v21 = vmul.f32 1.442695, %v639_v17  ;;  %1575 = vmatprep.subr.bf16.mxu0 %v1743_v3 }
 0x491   :  { %v758_v61 = vpop.xlane.xlu0 %757 }
 0x492   :  { %1688 = vpow2.f32 %v642_v21  ;;  %v762_v22 = vsub.f32 %v754_v8, %v758_v61 }
 0x493   :  { %1690 = vpow2.f32 %v766_v20 }
 0x494   :  { %v764_v27 = vmul.f32 1.442695, %v762_v22 }
 0x496   :  { %1692 = vpow2.f32 %v764_v27 }
 0x497   :  { %1694 = vpow2.f32 %v515_v25 }
 0x498   :  { %v1687_v28 = vpop.eup %1686  ;;  %1696 = vpow2.f32 %v517_v26 }
 0x499   :  { %v644_v29 = vsel %vm383_vm3, %v1687_v28, 0.0 }
 0x49a   :  { %645 = vadd.xlane.f32.xlu0 %v644_v29 }
 0x49c   :  { %v1689_v31 = vpop.eup %1688 }
 0x49d   :  { %v647_v34 = vsel %vm383_vm3, %v1689_v31, 0.0  ;;  %v1691_v35 = vpop.eup %1690 }
 0x49e   :  { %648 = vadd.xlane.f32.xlu1 %v647_v34  ;;  %v771_v39 = vsel %vm383_vm3, %v1691_v35, 0.0 }
 0x4a0   :  { %v1693_v36 = vpop.eup %1692 }
 0x4a1   :  { %v1695_v37 = vpop.eup %1694  ;;  %v768_v38 = vsel %vm383_vm3, %v1693_v36, 0.0 }
 0x4a2   :  { %v1697_v41 = vpop.eup %1696  ;;  %769 = vadd.xlane.f32.xlu0 %v768_v38  ;;  %772 = vadd.xlane.f32.xlu1 %v771_v39  ;;  %v519_v42 = vsel %vm383_vm3, %v1695_v37, 0.0 }
 0x4a3   :  { %v522_v44 = vsel %vm383_vm3, %v1697_v41, 0.0 }
 0x4a6   :  { %520 = vadd.xlane.f32.xlu0 %v519_v42  ;;  %523 = vadd.xlane.f32.xlu1 %v522_v44 }
 0x4b7   :  { %655 = vrot.lane.b32.xlu1 %v1910_v55, %s1747_s30 }
 0x4bb   :  { %779 = vrot.lane.b32.xlu1 %v1910_v55, %s1746_s29 }
 0x4bc   :  { %531 = vrot.lane.b32.xlu0 %v1910_v55, %s1745_s5 }
 0x527   :  { %v646_v46 = vpop.xlane.xlu0 %645 }
 0x52b   :  { %v649_v47 = vpop.xlane.xlu1 %648 }
 0x52f   :  { %v770_v48 = vpop.xlane.xlu0 %769  ;;  %v773_v49 = vpop.xlane.xlu1 %772 }
 0x533   :  { %v521_v50 = vpop.xlane.xlu0 %520  ;;  %v524_v51 = vpop.xlane.xlu1 %523 }
 0x534   :  { %1698 = vrcp.f32 %v521_v50 }
 0x535   :  { %1700 = vrcp.f32 %v524_v51 }
 0x536   :  { %1702 = vrcp.f32 %v649_v47 }
 0x537   :  { %v532_v52 = vpop.permute.xlu0 %531  ;;  %1704 = vrcp.f32 %v646_v46  ;;  %v656_v59 = vpop.permute.xlu1 %655 }
 0x538   :  { %1540 = vmatpush3.bf16.msra.mxu1 %v532_v52  ;;  %1706 = vrcp.f32 %v770_v48  ;;  %v1643_v52 = vld [vmem:[%s2178_s3 + $0x14] ss:$8 sps:$4 sm:$0xff]  }
 0x539   :  { %1551 = vmatprep.subr.bf16.mxu1 %v1743_v3  ;;  %1708 = vrcp.f32 %v773_v49 }
 0x53b   :  { %v780_v6 = vpop.permute.xlu1 %779 }
 0x53e   :  { %v1699_v53 = vpop.eup %1698 }
 0x53f   :  { %v1701_v54 = vpop.eup %1700  ;;  %v527_v56 = vmul.f32 %v1699_v53, %v1695_v37 }
 0x540   :  { %v528_v57 = vmul.f32 %v1701_v54, %v1697_v41  ;;  %v1703_v58 = vpop.eup %1702  ;;  %v864_v41 = vsub.s32 2, %v1887_v30 }
 0x541   :  { %v1705_v60 = vpop.eup %1704  ;;  %v653_v62 = vmul.f32 %v1703_v58, %v1689_v31 }
 0x542   :  { %v529_v55 = vpack.c.bf16 %v528_v57, %v527_v56  ;;  %v652_v0 = vmul.f32 %v1705_v60, %v1687_v28  ;;  %v1707_v1 = vpop.eup %1706  ;;  %v865_v42 = vrot.slane %v1893_v32, %v864_v41  ;;  %v1646_v60 = vld [vmem:[%s2178_s3 + $0x24] ss:$8 sps:$4 sm:$0xff]  }
 0x543   :  { %v1709_v5 = vpop.eup %1708  ;;  %v776_v7 = vmul.f32 %v1707_v1, %v1693_v36  ;;  %v1647_v1 = vld [vmem:[%s2178_s3 + $0x30] ss:$8 sps:$4 sm:$0xff]  }
 0x544   :  { %1542 = vmatmul.mubr.msk.bf16.vlgmr.msra.gmra.mrb[16].mxu1 %vm383_vm3, %v529_v55  ;;  %v654_v4 = vpack.c.bf16 %v653_v62, %v652_v0  ;;  %v777_v8 = vmul.f32 %v1709_v5, %v1691_v35  ;;  %v1644_v62 = vld [vmem:[%s2178_s3 + $0x20] ss:$8 sps:$4 sm:$0xff]   ;;  %v1649_v0 = vld [vmem:[%s2178_s3 + $0x34] ss:$8 sps:$4 sm:$0xff]  }
 0x545   :  { %1552 = vmatpush3.bf16.msra.mxu1 %v656_v59  ;;  %1553 = vmatprep.mubr.msk.bf16.mxu1 %vm1744_vm0, %v1743_v3  ;;  %v1650_v5 = vld [vmem:[%s2178_s3 + $0x40] ss:$8 sps:$4 sm:$0xff]  }
 0x546   :  { %1563 = vmatprep.subr.bf16.mxu1 %v1743_v3  ;;  %v778_v9 = vpack.c.bf16 %v777_v8, %v776_v7  ;;  %v1653_v7 = vld [vmem:[%s2178_s3 + $0x50] ss:$8 sps:$4 sm:$0xff]   ;;  %v1658_v8 = vld [vmem:[%s2178_s3 + $0x64] ss:$8 sps:$4 sm:$0xff]  }
 0x54c   :  { %1554 = vmatmul.mubr.msk.bf16.vlgmr.msra.gmra.mrb[20].mxu1 %vm383_vm3, %v654_v4  ;;  %v1652_v4 = vld [vmem:[%s2178_s3 + $0x44] ss:$8 sps:$4 sm:$0xff]  }
 0x54d   :  { %1564 = vmatpush3.bf16.msra.mxu1 %v780_v6  ;;  %1565 = vmatprep.mubr.msk.bf16.mxu1 %vm1744_vm0, %v1743_v3  ;;  %v1655_v6 = vld [vmem:[%s2178_s3 + $0x54] ss:$8 sps:$4 sm:$0xff]  }
 0x554   :  { %1566 = vmatmul.mubr.msk.bf16.vlgmr.msra.gmra.mrb[24].mxu1 %vm383_vm3, %v778_v9  ;;  %v1656_v9 = vld [vmem:[%s2178_s3 + $0x60] ss:$8 sps:$4 sm:$0xff]  }
 0x555   :  { %1129 = vmatprep.mubr.bf16.mxu1 %v1742_v2  ;;  %v1633_v2 = vld [vmem:[%s2177_s2 + $0x18] sm:$0xff]  }
 0x556   :  { %1576 = vmatpush3.bf16.msra.mxu0 %v1633_v2  ;;  %v1663_v2 = vld [vmem:[%s2179_s4] sm:$0xff]  }
 0x557   :  { %1577 = vmatprep.subr.bf16.mxu0 %v1743_v3 }
 0x55a   :  { %1578 = vmatpush3.bf16.msra.mxu0 %v1634_v13  ;;  %v1664_v13 = vld [vmem:[%s2179_s4 + $0x48] sm:$0xff]  }
 0x55b   :  { %1579 = vmatprep.subr.bf16.mxu0 %v1743_v3 }
 0x55e   :  { %1580 = vmatpush3.bf16.msra.mxu0 %v1635_v14  ;;  %v1665_v14 = vld [vmem:[%s2179_s4 + $0x8] sm:$0xff]  }
 0x55f   :  { %1581 = vmatprep.subr.bf16.mxu0 %v1743_v3 }
 0x562   :  { %1582 = vmatpush3.bf16.msra.mxu0 %v1636_v15  ;;  %v1667_v15 = vld [vmem:[%s2179_s4 + $0x10] sm:$0xff]  }
 0x563   :  { %1583 = vmatprep.subr.bf16.mxu0 %v1743_v3 }
 0x566   :  { %1584 = vmatpush3.bf16.msra.mxu0 %v1637_v18  ;;  %v1670_v18 = vld [vmem:[%s2179_s4 + $0x60] sm:$0xff]  }
 0x567   :  { %1479 = vmatprep.subr.bf16.mxu0 %v1662_v12 }
 0x617   :  { %v571_v63 = vpop.f32.mrb[16].mxu1 }
 0x618   :  { %v1543_v16 = vpop.f32.mrb[17].mxu1 }
 0x619   :  { %v574_v17 = vpop.f32.mrb[18].mxu1  ;;  %v1668_v16 = vld [vmem:[%s2179_s4 + $0x58] sm:$0xff]  }
 0x61a   :  { %v578_v19 = vpack.c.bf16 %v574_v17, %v571_v63  ;;  %v1544_v20 = vpop.f32.mrb[19].mxu1  ;;  %v1666_v63 = vld [vmem:[%s2179_s4 + $0x50] sm:$0xff]   ;;  %v1669_v17 = vld [vmem:[%s2179_s4 + $0x18] sm:$0xff]  }
 0x61b   :  { %v1672_v20 = vld [vmem:[%s2179_s4 + $0x68] sm:$0xff]  }
 0x61c   :  { %828 = vrot.lane.b32.xlu1 %v578_v19, %s1746_s29  ;;  %v1671_v19 = vld [vmem:[%s2179_s4 + $0x20] sm:$0xff]  }
 0x61f   :  { %v695_v21 = vpop.f32.mrb[20].mxu1 }
 0x620   :  { %v1555_v61 = vpop.f32.mrb[21].mxu1 }
 0x621   :  { %v698_v22 = vpop.f32.mrb[22].mxu1 }
 0x622   :  { %v702_v25 = vpack.c.bf16 %v698_v22, %v695_v21  ;;  %v1556_v26 = vpop.f32.mrb[23].mxu1 }
 0x624   :  { %831 = vrot.lane.b32.xlu0 %v702_v25, %s1747_s30 }
 0x627   :  { %v819_v27 = vpop.f32.mrb[24].mxu1 }
 0x628   :  { %v1567_v28 = vpop.f32.mrb[25].mxu1 }
 0x629   :  { %v822_v29 = vpop.f32.mrb[26].mxu1  ;;  %v982_v28 = vsub.s32 3, %v1887_v30 }
 0x62a   :  { %v826_v31 = vpack.c.bf16 %v822_v29, %v819_v27  ;;  %v1568_v34 = vpop.f32.mrb[27].mxu1 }
 0x62b   :  { %v983_v34 = vrot.slane %v1893_v32, %v982_v28  ;;  %v1351_v28 = vsub.s32 7, %v1887_v30 }
 0x62c   :  { %834 = vrot.lane.b32.xlu1 %v826_v31, %s1745_s5 }
 0x68e   :  { %v829_v35 = vpop.permute.xlu1 %828 }
 0x68f   :  { %v838_v36 = vsel %vm333_vm1, %v451_v45, %v829_v35  ;;  %v1640_v45 = vld [vmem:[%s2178_s3 + $0x4] ss:$8 sps:$4 sm:$0xff]   ;;  %v988_v35 = vsub.s32 4, %v1887_v30 }
 0x690   :  { %1097 = vmatprep.subr.bf16.mxu1 %v1640_v45 }
 0x691   :  { %1098 = vmatpush1.bf16.msra.mxu1 %v1638_v43 }
 0x692   :  { %1099 = vmatprep.subr.bf16.mxu1 %v1643_v52 }
 0x696   :  { %v832_v3 = vpop.permute.xlu0 %831 }
 0x697   :  { %v841_v37 = vsel %vm839_vm5, %v838_v36, %v832_v3 }
 0x69e   :  { %v835_v38 = vpop.permute.xlu1 %834 }
 0x69f   :  { %v844_v39 = vsel %vm842_vm6, %v841_v37, %v835_v38  ;;  %v989_v38 = vrot.slane %v1893_v32, %v988_v35  ;;  %v1352_v35 = vrot.slane %v1893_v32, %v1351_v28 }
 0x6a0   :  { %1586 = vmatmul.mubr.bf16.vlgmr.msra.gmra.mrb[12].mxu0 %v844_v39 }
 0x6a1   :  { %1480 = vmatpush3.bf16.msra.mxu0 %v1663_v2 }
 0x6a2   :  { %1481 = vmatprep.subr.bf16.mxu0 %v1664_v13 }
 0x6a5   :  { %1482 = vmatpush3.bf16.msra.mxu0 %v1665_v14 }
 0x6a6   :  { %1483 = vmatprep.subr.bf16.mxu0 %v1666_v63 }
 0x6a9   :  { %1484 = vmatpush3.bf16.msra.mxu0 %v1667_v15 }
 0x6aa   :  { %1485 = vmatprep.subr.bf16.mxu0 %v1668_v16 }
 0x6ad   :  { %1486 = vmatpush3.bf16.msra.mxu0 %v1669_v17 }
 0x6ae   :  { %1487 = vmatprep.subr.bf16.mxu0 %v1670_v18 }
 0x6b1   :  { %1488 = vmatpush3.bf16.msra.mxu0 %v1671_v19 }
 0x6b2   :  { %1489 = vmatprep.subr.bf16.mxu0 %v1672_v20 }
 0x773   :  { %v948_v44 = vpop.f32.mrb[12].mxu0 }
 0x774   :  { %v949_v46 = vadd.f32 %v948_v44, %v865_v42  ;;  %v1587_v47 = vpop.f32.mrb[13].mxu0 }
 0x775   :  { %v951_v48 = vpop.f32.mrb[14].mxu0  ;;  %v1674_v47 = vld [vmem:[%s2179_s4 + $0x70] sm:$0xff]  }
 0x776   :  { %v952_v49 = vadd.f32 %v951_v48, %v865_v42  ;;  %v1588_v50 = vpop.f32.mrb[15].mxu0  ;;  %v955_v51 = vadd.f32 %v949_v46, %v1857_v23  ;;  %v1641_v23 = vld [vmem:[%s2178_s3 + $0x10] ss:$8 sps:$4 sm:$0xff]   ;;  %v1673_v46 = vld [vmem:[%s2179_s4 + $0x28] sm:$0xff]  }
 0x777   :  { %1100 = vmatpush1.bf16.msra.mxu1 %v1641_v23  ;;  %1490 = vmatpush3.bf16.msra.mxu0 %v1673_v46  ;;  %v1675_v48 = vld [vmem:[%s2179_s4 + $0x30] sm:$0xff]   ;;  %v1677_v50 = vld [vmem:[%s2179_s4 + $0x38] sm:$0xff]  }
 0x778   :  { %957 = vadd.xlane.f32.xlu0 %v955_v51  ;;  %v956_v40 = vadd.f32 %v952_v49, %v1862_v24  ;;  %1101 = vmatprep.subr.bf16.mxu1 %v1646_v60  ;;  %v1676_v49 = vld [vmem:[%s2179_s4 + $0x78] sm:$0xff]   ;;  %s1748_s4 = smov [#allocation2]  }
 0x779   :  { %1491 = vmatprep.subr.bf16.mxu0 %v1674_v47  ;;  %s1362_s27 = sshll.u32 %s1748_s4, 4  ;;  %s1363_s27 = int_to_ptr.vmem [resolvable:$true] %s1362_s27 }
 0x77a   :  { %959 = vadd.xlane.f32.xlu1 %v956_v40  ;;  %s1718_s28 = scalar_lea.vmem %s1363_s27, 256  ;;  %p1723_p1 = scmp.lt.s32.totalorder %s1363_s27, %s1363_s27 }
 0x77b   :  { %1102 = vmatpush1.bf16.msra.mxu1 %v1644_v62  ;;  %1492 = vmatpush3.bf16.msra.mxu0 %v1675_v48  ;;  %p1719_p0 = scmp.ne.s32.totalorder %s1363_s27, %s1718_s28  ;;  %p1724_p2 = scmp.lt.s32.totalorder %s1718_s28, %s1718_s28 }
 0x77c   :  { %1103 = vmatprep.subr.bf16.mxu1 %v1649_v0  ;;  %1493 = vmatprep.subr.bf16.mxu0 %v1676_v49 }
 0x77d   :  { %p1725_p3 = por %p1724_p2, %p1723_p1 }
 0x77f   :  { %1104 = vmatpush1.bf16.msra.mxu1 %v1647_v1  ;;  %1494 = vmatpush3.bf16.msra.mxu0 %v1677_v50  ;;  %v1180_v1 = vsub.s32 5, %v1887_v30  ;;  %p1726_p4 = pnand %p1725_p3, %p1719_p0 }
 0x780   :  { %1105 = vmatprep.subr.bf16.mxu1 %v1652_v4 }
 0x783   :  { %1106 = vmatpush1.bf16.msra.mxu1 %v1650_v5 }
 0x784   :  { %1107 = vmatprep.subr.bf16.mxu1 %v1655_v6 }
 0x787   :  { %1108 = vmatpush1.bf16.msra.mxu1 %v1653_v7 }
 0x788   :  { %1109 = vmatprep.subr.bf16.mxu1 %v1658_v8 }
 0x78b   :  { %1110 = vmatpush1.bf16.msra.mxu1 %v1656_v9 }
 0x78c   :  { %1111 = vmatprep.subr.bf16.mxu1 %v1661_v10 }
 0x78f   :  { %1112 = vmatpush1.bf16.msra.mxu1 %v1659_v11 }
 0x805   :  { %v958_v24 = vpop.xlane.xlu0 %957 }
 0x806   :  { %v962_v53 = vmul.f32 0.0078125, %v958_v24 }
 0x807   :  { %v960_v54 = vpop.xlane.xlu1 %959 }
 0x808   :  { %v2056_v56 = vsub.f32 %v955_v51, %v962_v53  ;;  %v963_v57 = vmul.f32 0.0078125, %v960_v54  ;;  %v1011_v51 = vsub.s32 1, %v1887_v30 }
 0x80a   :  { %v2058_v55 = vsub.f32 %v956_v40, %v963_v57  ;;  %v966_v58 = vmul.f32 %v2056_v56, %v2056_v56  ;;  %v1012_v40 = vrot.slane %v1893_v32, %v1011_v51  ;;  %v1016_v43 = vrot.slane %v1898_v33, %v1011_v51 }
 0x80b   :  { %v1181_v33 = vrot.slane %v1893_v32, %v1180_v1 }
 0x80c   :  { %968 = vadd.xlane.f32.xlu0 %v966_v58  ;;  %v967_v59 = vmul.f32 %v2058_v55, %v2058_v55 }
 0x810   :  { %970 = vadd.xlane.f32.xlu0 %v967_v59 }
 0x899   :  { %v969_v21 = vpop.xlane.xlu0 %968 }
 0x89a   :  { %v972_v61 = vmul.f32 0.0078125, %v969_v21 }
 0x89c   :  { %v974_v22 = vadd.f32 1e-05, %v972_v61 }
 0x89d   :  { %v971_v25 = vpop.xlane.xlu0 %970 }
 0x89e   :  { %1710 = vrsqrt.f32 %v974_v22  ;;  %v973_v26 = vmul.f32 0.0078125, %v971_v25 }
 0x8a0   :  { %v975_v27 = vadd.f32 1e-05, %v973_v26 }
 0x8a2   :  { %1712 = vrsqrt.f32 %v975_v27  ;;  %v1345_v27 = vsub.s32 6, %v1887_v30 }
 0x8a8   :  { %v1711_v29 = vpop.eup %1710 }
 0x8a9   :  { %v978_v31 = vmul.f32 %v1711_v29, %v2056_v56  ;;  %v1346_v29 = vrot.slane %v1893_v32, %v1345_v27 }
 0x8ab   :  { %v984_v37 = vmul.f32 %v983_v34, %v978_v31 }
 0x8ac   :  { %v1713_v3 = vpop.eup %1712 }
 0x8ad   :  { %v979_v36 = vmul.f32 %v1713_v3, %v2058_v55  ;;  %v990_v41 = vadd.f32 %v989_v38, %v984_v37 }
 0x8af   :  { %v985_v39 = vmul.f32 %v983_v34, %v979_v36 }
 0x8b1   :  { %v991_v42 = vadd.f32 %v989_v38, %v985_v39 }
 0x8b3   :  { %v992_v44 = vpack.c.bf16 %v991_v42, %v990_v41 }
 0x8b5   :  { %1130 = vmatmul.mubr.bf16.vlgmr.msra.gmra.mrb[28].mxu1 %v992_v44 }
 0x988   :  { %v1131_v45 = vpop.f32.mrb[28].mxu1 }
 0x989   :  { %v1132_v52 = vadd.f32 %v1131_v45, %v1012_v40  ;;  %v1133_v23 = vpop.f32.mrb[29].mxu1 }
 0x98a   :  { %v1134_v24 = vadd.f32 %v1133_v23, %v1016_v43  ;;  %v1135_v53 = vpop.f32.mrb[30].mxu1 }
 0x98b   :  { %v1136_v54 = vadd.f32 %v1135_v53, %v1012_v40  ;;  %v1137_v56 = vpop.f32.mrb[31].mxu1  ;;  %v1140_v55 = vmax.f32 %v1132_v52, 0.0 }
 0x98c   :  { %v1138_v57 = vadd.f32 %v1137_v56, %v1016_v43  ;;  %v1141_v59 = vmax.f32 %v1134_v24, 0.0 }
 0x98d   :  { %v1142_v58 = vmax.f32 %v1136_v54, 0.0 }
 0x98e   :  { %v1143_v60 = vmax.f32 %v1138_v57, 0.0 }
 0x98f   :  { %v1144_v62 = vpack.c.bf16 %v1142_v58, %v1140_v55 }
 0x990   :  { %v1145_v0 = vpack.c.bf16 %v1143_v60, %v1141_v59 }
 0x992   :  { %1310 = vmatprep.mubr.bf16.mxu0 %v1145_v0 }
 0x993   :  { %1311 = vmatmul.mubr.bf16.vlgmr.msra.gmra.mrb[16].mxu0 %v1144_v62 }
 0xa66   :  { %v1495_v4 = vpop.f32.mrb[16].mxu0 }
 0xa67   :  { %v1496_v5 = vpop.f32.mrb[17].mxu0 }
 0xa68   :  { %v1497_v6 = vadd.f32 %v1496_v5, %v1495_v4  ;;  %v1498_v7 = vpop.f32.mrb[18].mxu0 }
 0xa69   :  { %v1499_v8 = vpop.f32.mrb[19].mxu0 }
 0xa6a   :  { %v1313_v9 = vadd.f32 %v1497_v6, %v1181_v33  ;;  %v1500_v10 = vadd.f32 %v1499_v8, %v1498_v7 }
 0xa6c   :  { %v1316_v11 = vadd.f32 %v1500_v10, %v1181_v33  ;;  %v1319_v12 = vadd.f32 %v1313_v9, %v990_v41 }
 0xa6e   :  { %1321 = vadd.xlane.f32.xlu0 %v1319_v12  ;;  %v1320_v2 = vadd.f32 %v1316_v11, %v991_v42 }
 0xa70   :  { %1323 = vadd.xlane.f32.xlu1 %v1320_v2 }
 0xafb   :  { %v1322_v13 = vpop.xlane.xlu0 %1321 }
 0xafc   :  { %v1325_v14 = vmul.f32 0.0078125, %v1322_v13 }
 0xafd   :  { %v1324_v63 = vpop.xlane.xlu1 %1323 }
 0xafe   :  { %v1327_v15 = vsub.f32 %v1319_v12, %v1325_v14  ;;  %v1326_v16 = vmul.f32 0.0078125, %v1324_v63 }
 0xb00   :  { %v1328_v17 = vsub.f32 %v1320_v2, %v1326_v16  ;;  %v1329_v18 = vmul.f32 %v1327_v15, %v1327_v15 }
 0xb02   :  { %1331 = vadd.xlane.f32.xlu0 %v1329_v18  ;;  %v1330_v19 = vmul.f32 %v1328_v17, %v1328_v17 }
 0xb04   :  { %1333 = vadd.xlane.f32.xlu1 %v1330_v19 }
 0xb8f   :  { %v1332_v20 = vpop.xlane.xlu0 %1331 }
 0xb90   :  { %v1335_v21 = vmul.f32 0.0078125, %v1332_v20 }
 0xb91   :  { %v1334_v61 = vpop.xlane.xlu1 %1333 }
 0xb92   :  { %v1337_v22 = vadd.f32 1e-05, %v1335_v21  ;;  %v1336_v25 = vmul.f32 0.0078125, %v1334_v61 }
 0xb94   :  { %1714 = vrsqrt.f32 %v1337_v22  ;;  %v1338_v26 = vadd.f32 1e-05, %v1336_v25 }
 0xb96   :  { %1716 = vrsqrt.f32 %v1338_v26 }
 0xb9e   :  { %v1715_v31 = vpop.eup %1714 }
 0xb9f   :  { %v1341_v34 = vmul.f32 %v1715_v31, %v1327_v15 }
 0xba0   :  { %v1717_v3 = vpop.eup %1716 }
 0xba1   :  { %v1342_v36 = vmul.f32 %v1717_v3, %v1328_v17  ;;  %v1347_v37 = vmul.f32 %v1346_v29, %v1341_v34 }
 0xba3   :  { %v1348_v38 = vmul.f32 %v1346_v29, %v1342_v36  ;;  %v1353_v39 = vadd.f32 %v1352_v35, %v1347_v37 }
 0xba5   :  { %v1354_v41 = vadd.f32 %v1352_v35, %v1348_v38  ;;  %1355 = vst [vmem:[#allocation2] sm:$0xff] %v1353_v39 }
 0xba7   :  { %1356 = vst [vmem:[#allocation2 + $0x8] sm:$0xff] %v1354_v41 }
 0xba8   :  { %1729 = shalt.err (!%p1726_p4)
}
 0xba9   :  { %s1730_s30 = scalar_lea.hbm %s2181_s6, 256 }
 0xbaa   :  { %p1731_p5 = scmp.ne.s32.totalorder %s2181_s6, %s1730_s30  ;;  %p1734_p6 = scmp.lt.u32.totalorder %s1730_s30, %s2181_s6 }
 0xbac   :  { %p1736_p7 = pnand %p1734_p6, %p1731_p5 }
 0xbae   :  { %1739 = shalt.err (!%p1736_p7)
}
 0xbaf   :  { %s1749_s10 = smov 128   ;;  %s1750_s11 = smov 8  }
 0xbb0   :  { %1368 = dma.vmem_to_hbm [thread:$0]  %s1363_s27, 256, %s2181_s6, [#allocation3], %s1749_s10, %s1749_s10, %s1750_s11  }
 0xbb1   :  { %1740 = dma.done.wait [#allocation3], 256  }
 0xbb2   :  { %1741 = vsyncadd [#allocation3], 4294967040 }
 0xbb3   :  { %1372 = vsyncpa [#allocation3], 1 }

</bundles_post_ra>
